<compile_context>
chip_gen: v7x
topology: tpu7x:2x2x1
jax: 0.10.0
libtpu: 0.0.40
codegen_flags: <defaults>
</compile_context>

<pallas_src>
import functools

import jax
import jax.numpy as jnp
from jax.experimental import pallas as pl
from jax.experimental.pallas import tpu as pltpu

ALPHA = 0.25
GAMMA = 2.0
LANES = 128

# Route to the tiled/pipelined path once the raw inputs exceed this many bytes
# (keeps the gridless path well inside every chip's scoped-VMEM default,
# including v7x's 32 MiB scoped / 64 MiB physical).
_MAX_SINGLE_TILE_BYTES = 8 << 20


def _pow_gamma(pt, gamma):
    """pt ** gamma with strength reduction for small integer gamma."""
    g = float(gamma)
    if g == 2.0:
        return pt * pt
    if g.is_integer() and 0.0 <= g <= 8.0:
        n = int(g)
        if n == 0:
            return jnp.ones_like(pt)
        out = pt
        for _ in range(n - 1):
            out = out * pt
        return out
    return pt ** gamma  # generic (non-integer) gamma: falls back to exp/log pow


def _focal_elementwise(x, z, alpha, gamma):
    """Per-element focal loss (f32 in, f32 out). One exp, one log1p, one vrcp."""
    e = jnp.exp(-jnp.abs(x))                 # shared exp(-|x|), EUP
    d = 1.0 + e
    r = pl.reciprocal(d, approx=True)        # EUP vrcp
    r = r * (2.0 - d * r)                    # Newton step (VPU) -> ~f32-exact 1/(1+e)
    p = jnp.where(x >= 0.0, r, 1.0 - r)      # sigmoid(x)

    # Folded forms (fewer VALU ops than the textbook expressions):
    #   pt      = (1-p)*z + p*(1-z)            = z + p*(1 - 2z)
    #   alpha_t = alpha*z + (1-alpha)*(1-z)    = (1-alpha) + (2*alpha-1)*z
    pt = z + p * (1.0 - 2.0 * z)
    alpha_t = (1.0 - alpha) + (2.0 * alpha - 1.0) * z
    focal_weight = alpha_t * _pow_gamma(pt, gamma)

    # numerically-stable BCE-with-logits (reduction='none'), reusing e:
    #   max(x, 0) - x * z + log(1 + exp(-|x|))
    bce = jnp.maximum(x, 0.0) - x * z + jnp.log1p(e)
    return bce * focal_weight


def _focal_partial_row_kernel(pred_ref, tgt_ref, out_ref, *, alpha, gamma):
    """Reduce one (tm, 128) tile to a lane-dense (1, 128) partial-sum row."""
    x = pred_ref[...].astype(jnp.float32)
    z = tgt_ref[...].astype(jnp.float32)
    loss = _focal_elementwise(x, z, alpha, gamma)
    out_ref[...] = jnp.sum(loss, axis=0, keepdims=True)


def _choose_tile_rows(rows, tile_rows, align):
    """Largest divisor of `rows` that is <= tile_rows and sublane-aligned."""
    tm = min(tile_rows, rows)
    for cand in range(tm, 0, -1):
        if rows % cand == 0 and (cand % align == 0 or cand == rows):
            return cand
    return rows


def focal_loss(pred, target, alpha=ALPHA, gamma=GAMMA, *, tile_rows=4096,
               target_dtype=jnp.bfloat16, force_tiled=False):
    """Mean sigmoid focal loss over all elements of pred/target.

    target_dtype: dtype of the target stream shipped to the kernel. bf16 is
    exact for hard 0/1 labels (the common detection case) and halves the HBM
    bytes of the target; pass jnp.float32 for soft labels that need full f32.
    """
    assert pred.shape == target.shape
    n_total = pred.size
    # TODO(synk): pad the flattened stream if n_total % 128 != 0.
    assert n_total % LANES == 0, "example sizes chosen so total elems % 128 == 0"
    rows = n_total // LANES

    pred2d = pred.reshape(rows, LANES)                       # keep input dtype
    tgt2d = target.reshape(rows, LANES).astype(target_dtype)  # narrow HBM stream

    alpha = float(alpha)
    gamma = float(gamma)
    kernel = functools.partial(_focal_partial_row_kernel, alpha=alpha, gamma=gamma)

    input_bytes = rows * LANES * (pred2d.dtype.itemsize + tgt2d.dtype.itemsize)

    if (not force_tiled) and input_bytes <= _MAX_SINGLE_TILE_BYTES:
        # Gridless fast path (covers the shipped 2x4x16x16 case): whole problem
        # in one VMEM tile, no pipeline overhead, no partial-row plumbing.
        partial = pl.pallas_call(
            kernel,
            out_shape=jax.ShapeDtypeStruct((1, LANES), jnp.float32),
        )(pred2d, tgt2d)
    else:
        # Tiled path: each grid step writes its own (1,128) partial row, so the
        # axis is fully "parallel" (both TensorCores on v7x) and no accumulator
        # or init/finalize pl.when is needed.
        # Sublane alignment of the tile: 8 for 4-byte, 16 for 2-byte, 32 for
        # 1-byte streams -- take the strictest one among the two inputs.
        align = max(8, 32 // min(pred2d.dtype.itemsize, tgt2d.dtype.itemsize))
        tm = _choose_tile_rows(rows, tile_rows, align)
        grid_steps = rows // tm

        # VMEM: 2 bufs * tm*128*(pred_bytes + tgt_bytes) + tiny output.
        # At tm=4096 with f32 pred / bf16 tgt that's ~6 MiB; declare the limit.
        partial = pl.pallas_call(
            kernel,
            out_shape=jax.ShapeDtypeStruct((grid_steps, 1, LANES), jnp.float32),
            grid_spec=pltpu.PrefetchScalarGridSpec(
                num_scalar_prefetch=0,
                grid=(grid_steps,),
                in_specs=[
                    pl.BlockSpec((tm, LANES), lambda i: (i, 0)),
                    pl.BlockSpec((tm, LANES), lambda i: (i, 0)),
                ],
                out_specs=pl.BlockSpec((None, 1, LANES), lambda i: (i, 0, 0)),
            ),
            compiler_params=pltpu.CompilerParams(
                dimension_semantics=("parallel",),
                vmem_limit_bytes=32 << 20,
            ),
        )(pred2d, tgt2d)

    # Final 128-lane (and, for the tiled path, grid_steps-row) sum + divide in
    # plain JAX: avoids masked (1,1) stores and in-kernel cross-lane reduces.
    return jnp.sum(partial) / jnp.float32(n_total)


def focal_loss_ref(pred, target, alpha=ALPHA, gamma=GAMMA):
    pred = pred.astype(jnp.float32)
    target = target.astype(jnp.float32)
    p = jax.nn.sigmoid(pred)
    pt = (1.0 - p) * target + p * (1.0 - target)
    fw = (alpha * target + (1.0 - alpha) * (1.0 - target)) * pt**gamma
    bce = jnp.maximum(pred, 0.0) - pred * target + jnp.log1p(jnp.exp(-jnp.abs(pred)))
    return jnp.mean(bce * fw)


if __name__ == "__main__":
    key = jax.random.PRNGKey(0)
    k_pred, k_tgt, k_pred2, k_tgt2 = jax.random.split(key, 4)

    # NCHW inputs, consistent with a detection head's logits / binary targets.
    shape = (2, 4, 16, 16)
    pred = jax.random.normal(k_pred, shape, dtype=jnp.float32)
    target = (jax.random.uniform(k_tgt, shape) > 0.5).astype(jnp.float32)

    ref = focal_loss_ref(pred, target)

    # Gridless fast path (the shipped size).
    loss = jax.block_until_ready(focal_loss(pred, target))
    assert jnp.allclose(loss, ref, atol=1e-5, rtol=1e-5), (loss, ref)

    # Exercise the multi-step tiled (parallel partial-row) path on a slightly
    # larger problem: 2x8x32x64 -> 256 rows of 128 lanes, 4 grid steps of 64.
    shape2 = (2, 8, 32, 64)
    pred2 = jax.random.normal(k_pred2, shape2, dtype=jnp.float32)
    target2 = (jax.random.uniform(k_tgt2, shape2) > 0.5).astype(jnp.float32)
    ref2 = focal_loss_ref(pred2, target2)
    loss2 = jax.block_until_ready(
        focal_loss(pred2, target2, tile_rows=64, force_tiled=True))
    assert jnp.allclose(loss2, ref2, atol=1e-5, rtol=1e-5), (loss2, ref2)

    print("KERNEL_OK")
</pallas_src>

<mosaic_0001>
module attributes {stable_mosaic.version = 11 : i64} {
  func.func @_focal_partial_row_kernel(%arg0: memref<16x128xf32, #tpu.memory_space<vmem>>, %arg1: memref<16x128xbf16, #tpu.memory_space<vmem>>, %arg2: memref<1x128xf32, #tpu.memory_space<vmem>>) attributes {dimension_semantics = [], scalar_prefetch = 0 : i64, scratch_operands = 0 : i64, tpu.core_type = #tpu.core_type<tc>} {
    %c0 = arith.constant 0 : index
    %c0_0 = arith.constant 0 : index
    %0 = vector.load %arg0[%c0, %c0_0] : memref<16x128xf32, #tpu.memory_space<vmem>>, vector<16x128xf32>
    %c0_1 = arith.constant 0 : index
    %c0_2 = arith.constant 0 : index
    %1 = vector.load %arg1[%c0_1, %c0_2] : memref<16x128xbf16, #tpu.memory_space<vmem>>, vector<16x128xbf16>
    %2 = arith.extf %1 : vector<16x128xbf16> to vector<16x128xf32>
    %3 = math.absf %0 : vector<16x128xf32>
    %cst = arith.constant 0.000000e+00 : f32
    %4 = vector.broadcast %cst : f32 to vector<16x128xf32>
    %5 = arith.subf %4, %3 : vector<16x128xf32>
    %6 = math.exp %5 : vector<16x128xf32>
    %cst_3 = arith.constant 1.000000e+00 : f32
    %7 = vector.broadcast %cst_3 : f32 to vector<16x128xf32>
    %8 = arith.addf %7, %6 : vector<16x128xf32>
    %9 = tpu.reciprocal %8 {approx = true} : vector<16x128xf32> -> vector<16x128xf32>
    %10 = arith.mulf %8, %9 : vector<16x128xf32>
    %cst_4 = arith.constant 2.000000e+00 : f32
    %11 = vector.broadcast %cst_4 : f32 to vector<16x128xf32>
    %12 = arith.subf %11, %10 : vector<16x128xf32>
    %13 = arith.mulf %9, %12 : vector<16x128xf32>
    %cst_5 = arith.constant 0.000000e+00 : f32
    %14 = vector.broadcast %cst_5 : f32 to vector<16x128xf32>
    %15 = arith.cmpf oge, %0, %14 : vector<16x128xf32>
    %cst_6 = arith.constant 1.000000e+00 : f32
    %16 = vector.broadcast %cst_6 : f32 to vector<16x128xf32>
    %17 = arith.subf %16, %13 : vector<16x128xf32>
    %18 = arith.select %15, %13, %17 : vector<16x128xi1>, vector<16x128xf32>
    %cst_7 = arith.constant 2.000000e+00 : f32
    %19 = vector.broadcast %cst_7 : f32 to vector<16x128xf32>
    %20 = arith.mulf %19, %2 : vector<16x128xf32>
    %cst_8 = arith.constant 1.000000e+00 : f32
    %21 = vector.broadcast %cst_8 : f32 to vector<16x128xf32>
    %22 = arith.subf %21, %20 : vector<16x128xf32>
    %23 = arith.mulf %18, %22 : vector<16x128xf32>
    %24 = arith.addf %2, %23 : vector<16x128xf32>
    %cst_9 = arith.constant -5.000000e-01 : f32
    %25 = vector.broadcast %cst_9 : f32 to vector<16x128xf32>
    %26 = arith.mulf %25, %2 : vector<16x128xf32>
    %cst_10 = arith.constant 7.500000e-01 : f32
    %27 = vector.broadcast %cst_10 : f32 to vector<16x128xf32>
    %28 = arith.addf %27, %26 : vector<16x128xf32>
    %29 = arith.mulf %24, %24 : vector<16x128xf32>
    %30 = arith.mulf %28, %29 : vector<16x128xf32>
    %cst_11 = arith.constant 0.000000e+00 : f32
    %31 = vector.broadcast %cst_11 : f32 to vector<16x128xf32>
    %32 = arith.maximumf %0, %31 : vector<16x128xf32>
    %33 = arith.mulf %0, %2 : vector<16x128xf32>
    %34 = arith.subf %32, %33 : vector<16x128xf32>
    %35 = math.log1p %6 : vector<16x128xf32>
    %36 = arith.addf %34, %35 : vector<16x128xf32>
    %37 = arith.mulf %36, %30 : vector<16x128xf32>
    %cst_12 = arith.constant dense<0.000000e+00> : vector<128xf32>
    %38 = vector.multi_reduction <add>, %37, %cst_12 [0] : vector<16x128xf32> to vector<128xf32>
    %39 = vector.shape_cast %38 : vector<128xf32> to vector<1x128xf32>
    %c0_13 = arith.constant 0 : index
    %c0_14 = arith.constant 0 : index
    %40 = vector.load %arg2[%c0_13, %c0_14] : memref<1x128xf32, #tpu.memory_space<vmem>>, vector<1x128xf32>
    tpu.vector_store %arg2[%c0_13, %c0_14], %39 {strides = array<i32>} : memref<1x128xf32, #tpu.memory_space<vmem>>, vector<1x128xf32>,
    return
  }
}

</mosaic_0001>

<bundles_post_ra>
// kernel: tpu_custom_call.1
= control target key start
LH: loop header
LB: loop body
LE: loop exit
PB: predicated region body
PF: predicated region fallthrough
CT: control target
= control target key end

     0   :  { %7 = vsyncpa [#allocation3], 0  ;;  %s299_s0 = inlined_call_operand.hbm [shape: f32[16,128], index: 0, kind: input, shape index: {}]   ;;  %s300_s1 = inlined_call_operand.hbm [shape: bf16[16,128], index: 1, kind: input, shape index: {}]   ;;  %s301_s2 = inlined_call_operand.hbm [shape: f32[1,128], index: 2, kind: output, shape index: {}]  }
   0x1   :  { %8 = vsyncpa [#allocation6], 0 }
   0x2   :  { %9 = vsyncpa [#allocation4], 0  ;;  %s233_s9 = smov [#allocation2]   ;;  %s161_s13 = scalar_lea.hbm %s299_s0, 256 }
   0x3   :  { %s15_s10 = sshll.u32 %s233_s9, 4  ;;  %p162_p0 = scmp.ne.s32.totalorder %s299_s0, %s161_s13  ;;  %s16_s10 = int_to_ptr.vmem [resolvable:$true] %s15_s10 }
   0x4   :  { %p165_p1 = scmp.lt.u32.totalorder %s161_s13, %s299_s0 }
   0x6   :  { %p167_p2 = pnand %p165_p1, %p162_p0 }
   0x8   :  { %170 = shalt.err (!%p167_p2)
}
   0x9   :  { %s171_s18 = scalar_lea.vmem %s16_s10, 256  ;;  %p176_p4 = scmp.lt.s32.totalorder %s16_s10, %s16_s10 }
   0xa   :  { %p172_p3 = scmp.ne.s32.totalorder %s16_s10, %s171_s18  ;;  %p177_p5 = scmp.lt.s32.totalorder %s171_s18, %s171_s18 }
   0xc   :  { %p178_p6 = por %p177_p5, %p176_p4 }
   0xe   :  { %p179_p7 = pnand %p178_p6, %p172_p3 }
  0x10   :  { %182 = shalt.err (!%p179_p7)
}
  0x11   :  { %s234_s19 = smov 128   ;;  %s235_s20 = smov 8  }
  0x12   :  { %21 = dma.hbm_to_vmem [thread:$0]  %s299_s0, 256, %s16_s10, [#allocation3], %s234_s19, %s234_s19, %s235_s20  }
  0x13   :  { %s236_s23 = smov [#allocation5]   ;;  %s183_s27 = scalar_lea.hbm %s300_s1, 128 }
  0x14   :  { %s27_s24 = sshll.u32 %s236_s23, 4  ;;  %p184_p8 = scmp.ne.s32.totalorder %s300_s1, %s183_s27  ;;  %s28_s24 = int_to_ptr.vmem [resolvable:$true] %s27_s24 }
  0x15   :  { %p187_p9 = scmp.lt.u32.totalorder %s183_s27, %s300_s1 }
  0x17   :  { %p189_p10 = pnand %p187_p9, %p184_p8 }
  0x19   :  { %192 = shalt.err (!%p189_p10)
}
  0x1a   :  { %s193_s4 = scalar_lea.vmem %s28_s24, 128  ;;  %p198_p12 = scmp.lt.s32.totalorder %s28_s24, %s28_s24 }
  0x1b   :  { %p194_p11 = scmp.ne.s32.totalorder %s28_s24, %s193_s4  ;;  %p199_p13 = scmp.lt.s32.totalorder %s193_s4, %s193_s4 }
  0x1d   :  { %p200_p0 = por %p199_p13, %p198_p12 }
  0x1f   :  { %p201_p1 = pnand %p200_p0, %p194_p11 }
  0x21   :  { %204 = shalt.err (!%p201_p1)
}
  0x22   :  { %s237_s0 = smov 64   ;;  %s238_s5 = smov 4  }
  0x23   :  { %33 = dma.hbm_to_vmem [thread:$0]  %s300_s1, 128, %s28_s24, [#allocation6], %s237_s0, %s237_s0, %s238_s5  }
  0x24   :  { %227 = dma.done.wait [#allocation3], 256  }
  0x25   :  { %228 = vsyncadd [#allocation3], 4294967040 }
  0x26   :  { %229 = dma.done.wait [#allocation6], 128  }
  0x27   :  { %230 = vsyncadd [#allocation6], 4294967168  ;;  %v40_v0 = vld [vmem:[#allocation2] sm:$0xff]  ;;  %v41_v1 = vld [vmem:[#allocation2 + $0x8] sm:$0xff]  ;;  %s239_s1 = smov [#allocation7]  }
  0x28   :  { %v46_v2 = vand.u32 2147483647, %v40_v0  ;;  %v47_v3 = vand.u32 2147483647, %v41_v1  ;;  %v139_v12 = vld [vmem:[#allocation5] sm:$0xff]   ;;  %vm64_vm0 = vcmp.ge.f32.partialorder %v40_v0, 0.0 }
  0x29   :  { %v140_v13 = vunpack.c.l.bf16 %v139_v12  ;;  %v141_v14 = vunpack.c.h.bf16 %v139_v12  ;;  %vm65_vm1 = vcmp.ge.f32.partialorder %v41_v1, 0.0  ;;  %v86_v27 = vmax.f32 %v40_v0, 0.0  ;;  %s128_s8 = sshll.u32 %s239_s1, 4  ;;  %s129_s8 = int_to_ptr.vmem [resolvable:$true] %s128_s8 }
  0x2a   :  { %v48_v4 = vsub.f32 0.0, %v46_v2  ;;  %v49_v5 = vsub.f32 0.0, %v47_v3  ;;  %v87_v33 = vmax.f32 %v41_v1, 0.0  ;;  %s205_s9 = scalar_lea.vmem %s129_s8, 16  ;;  %s209_s10 = scalar_lea.vmem %s129_s8, 32 }
  0x2b   :  { %v70_v21 = vmul.f32 2.0, %v140_v13  ;;  %v71_v23 = vmul.f32 2.0, %v141_v14  ;;  %v78_v32 = vmul.f32 -0.5, %v140_v13  ;;  %v88_v37 = vmul.f32 %v140_v13, %v40_v0  ;;  %p206_p2 = scmp.ne.s32.totalorder %s129_s8, %s205_s9  ;;  %p210_p3 = scmp.lt.s32.totalorder %s129_s8, %s129_s8 }
  0x2c   :  { %v50_v6 = vmul.f32 1.442695, %v48_v4  ;;  %v52_v7 = vmul.f32 1.442695, %v49_v5  ;;  %v89_v38 = vmul.f32 %v141_v14, %v41_v1  ;;  %v79_v48 = vmul.f32 -0.5, %v141_v14  ;;  %p211_p4 = scmp.lt.s32.totalorder %s209_s10, %s205_s9 }
  0x2d   :  { %v72_v36 = vsub.f32 1.0, %v70_v21  ;;  %v73_v40 = vsub.f32 1.0, %v71_v23  ;;  %v90_v51 = vsub.f32 %v86_v27, %v88_v37  ;;  %v80_v56 = vadd.f32 0.75, %v78_v32 }
  0x2e   :  { %149 = vpow2.f32 %v50_v6  ;;  %v91_v53 = vsub.f32 %v87_v33, %v89_v38  ;;  %v81_v59 = vadd.f32 0.75, %v79_v48  ;;  %p212_p5 = por %p211_p4, %p210_p3 }
  0x2f   :  { %151 = vpow2.f32 %v52_v7 }
  0x30   :  { %p213_p6 = pnand %p212_p5, %p206_p2 }
  0x38   :  { %v150_v8 = vpop.eup %149 }
  0x39   :  { %v152_v9 = vpop.eup %151  ;;  %v54_v10 = vadd.f32 1.0, %v150_v8  ;;  %v95_v15 = vmul.f32 -0.5, %v150_v8  ;;  %v98_v28 = vand.u32 2147483647, %v150_v8 }
  0x3a   :  { %v55_v11 = vadd.f32 1.0, %v152_v9  ;;  %v104_v17 = vmul.f32 -0.5, %v152_v9  ;;  %v107_v34 = vand.u32 2147483647, %v152_v9 }
  0x3b   :  { %153 = vrcp.f32 %v54_v10  ;;  %v96_v24 = vadd.f32 1.0, %v95_v15  ;;  %vm279_vm2 = vcmp.lt.f32.partialorder %v98_v28, 0.0004427343 }
  0x3c   :  { %155 = vrcp.f32 %v55_v11  ;;  %v105_v29 = vadd.f32 1.0, %v104_v17  ;;  %vm108_vm3 = vcmp.lt.f32.partialorder %v107_v34, 0.0004427343 }
  0x3d   :  { %157 = vlog2.f32 %v54_v10  ;;  %v97_v42 = vmul.f32 %v150_v8, %v96_v24 }
  0x3e   :  { %159 = vlog2.f32 %v55_v11  ;;  %v106_v46 = vmul.f32 %v152_v9, %v105_v29 }
  0x45   :  { %v154_v16 = vpop.eup %153 }
  0x46   :  { %v156_v18 = vpop.eup %155  ;;  %v58_v19 = vmul.f32 %v154_v16, %v54_v10 }
  0x47   :  { %v59_v20 = vmul.f32 %v156_v18, %v55_v11  ;;  %v158_v25 = vpop.eup %157 }
  0x48   :  { %v60_v22 = vsub.f32 2.0, %v58_v19  ;;  %v160_v30 = vpop.eup %159  ;;  %v94_v41 = vmul.f32 0.6931472, %v158_v25 }
  0x49   :  { %v61_v26 = vsub.f32 2.0, %v59_v20  ;;  %v103_v45 = vmul.f32 0.6931472, %v160_v30 }
  0x4a   :  { %v62_v31 = vmul.f32 %v154_v16, %v60_v22  ;;  %v100_v54 = vsel %vm279_vm2, %v97_v42, %v94_v41 }
  0x4b   :  { %v63_v35 = vmul.f32 %v156_v18, %v61_v26  ;;  %v109_v57 = vsel %vm108_vm3, %v106_v46, %v103_v45  ;;  %v110_v61 = vadd.f32 %v100_v54, %v90_v51 }
  0x4c   :  { %v66_v39 = vsub.f32 1.0, %v62_v31  ;;  %v111_v63 = vadd.f32 %v109_v57, %v91_v53 }
  0x4d   :  { %v67_v43 = vsub.f32 1.0, %v63_v35 }
  0x4e   :  { %v68_v47 = vsel %vm64_vm0, %v62_v31, %v66_v39 }
  0x4f   :  { %v69_v49 = vsel %vm65_vm1, %v63_v35, %v67_v43  ;;  %v74_v50 = vmul.f32 %v72_v36, %v68_v47 }
  0x50   :  { %v75_v52 = vmul.f32 %v73_v40, %v69_v49 }
  0x51   :  { %v76_v55 = vadd.f32 %v140_v13, %v74_v50 }
  0x52   :  { %v77_v58 = vadd.f32 %v141_v14, %v75_v52 }
  0x53   :  { %v82_v60 = vmul.f32 %v76_v55, %v76_v55 }
  0x54   :  { %v83_v62 = vmul.f32 %v77_v58, %v77_v58 }
  0x55   :  { %v84_v0 = vmul.f32 %v82_v60, %v80_v56 }
  0x56   :  { %v85_v2 = vmul.f32 %v83_v62, %v81_v59 }
  0x57   :  { %v112_v1 = vmul.f32 %v110_v61, %v84_v0 }
  0x58   :  { %v113_v3 = vmul.f32 %v111_v63, %v85_v2 }
  0x5a   :  { %v114_v4 = vadd.f32 %v113_v3, %v112_v1 }
  0x5c   :  { %v115_v5 = vrot.slane %v114_v4, 4 }
  0x5e   :  { %v116_v6 = vadd.f32 %v115_v5, %v114_v4 }
  0x60   :  { %v117_v7 = vrot.slane %v116_v6, 2 }
  0x62   :  { %v118_v8 = vadd.f32 %v117_v7, %v116_v6 }
  0x64   :  { %v119_v9 = vrot.slane %v118_v8, 1 }
  0x66   :  { %v120_v10 = vadd.f32 %v119_v9, %v118_v8 }
  0x68   :  { %121 = vst [vmem:[#allocation7] sm:$0x1] %v120_v10 }
  0x69   :  { %216 = shalt.err (!%p213_p6)
}
  0x6a   :  { %s217_s13 = scalar_lea.hbm %s301_s2, 16 }
  0x6b   :  { %p218_p7 = scmp.ne.s32.totalorder %s301_s2, %s217_s13  ;;  %p221_p8 = scmp.lt.u32.totalorder %s217_s13, %s301_s2 }
  0x6d   :  { %p223_p9 = pnand %p221_p8, %p218_p7 }
  0x6f   :  { %226 = shalt.err (!%p223_p9)
}
  0x70   :  { %131 = dma.vmem_to_hbm [thread:$0]  %s129_s8, 16, %s301_s2, [#allocation4]  }
  0x71   :  { %231 = dma.done.wait [#allocation4], 16  }
  0x72   :  { %232 = vsyncadd [#allocation4], 4294967280 }
  0x73   :  { %135 = vsyncpa [#allocation3], 1 }
  0x74   :  { %136 = vsyncpa [#allocation6], 1 }
  0x75   :  { %137 = vsyncpa [#allocation4], 1 }

</bundles_post_ra>
